<compile_context>
chip_gen: v5e
topology: v5e:2x2
jax: 0.10.0
libtpu: 0.0.40
codegen_flags: <defaults>
</compile_context>

<pallas_src>
import functools

import jax
import jax.numpy as jnp
from jax.experimental import pallas as pl
from jax.experimental.pallas import tpu as pltpu


def _round_up(x, m):
    return ((x + m - 1) // m) * m


def _fused_mlp_kernel(*refs, out_dims):
    """refs = (x_ref, w_0, ..., w_{L-1}, b_all_ref, o_ref).

    Hidden layers run on the MXU (bf16 operands, f32 accumulation); the final
    Dout == 1 layer is a per-lane multiply + cross-lane sum (VPU/XLU) so the
    MXU is not paid for a K x 1 matmul.  ReLU is applied after every layer
    (including the last), matching Net2.  The per-tile result is stored
    lane-dense as a (1, tile_b) row.
    """
    num_layers = len(out_dims)
    x_ref = refs[0]
    w_refs = refs[1:1 + num_layers]
    b_all_ref = refs[1 + num_layers]
    o_ref = refs[2 + num_layers]

    h = x_ref[...]                               # (tile_b, Din), bf16
    off = 0
    for li in range(num_layers - 1):
        dout = out_dims[li]
        w = w_refs[li][...]                      # (Din_l, Dout_l), bf16
        b = b_all_ref[:, off:off + dout]         # (1, Dout_l), f32
        off += dout
        h = jnp.dot(h.astype(w.dtype), w, preferred_element_type=jnp.float32)
        h = jnp.maximum(h + b, 0.0)              # f32 activations

    # Final layer (Dout == 1): VPU multiply + XLU reduce instead of MXU matmul.
    w_row = w_refs[num_layers - 1][...]          # (1, Dlast), f32
    b_last = b_all_ref[:, off:off + 1]           # (1, 1),     f32
    y = jnp.sum(h.astype(jnp.float32) * w_row, axis=-1, keepdims=True) + b_last
    y = jnp.maximum(y, 0.0)                      # (tile_b, 1)
    # Lane-dense store: (tile_b, 1) -> (1, tile_b) transpose (XLU slot is
    # otherwise idle); avoids masked vst + sublane-strided write-back.
    o_ref[...] = jnp.transpose(y).astype(o_ref.dtype)


def mlp_forward(params, x, *, mxu_dtype=jnp.bfloat16):
    """Fused forward pass: one pallas_call for the whole MLP.

    Only the batch dimension is tiled; every weight/bias stays VMEM-resident
    across grid steps and intermediate activations never touch HBM.
    """
    B, Din = x.shape
    num_layers = len(params)
    assert num_layers >= 1
    out_dims = tuple(int(w.shape[1]) for w, _ in params)
    assert out_dims[-1] == 1, "Net2's final layer must have Dout == 1"
    out_dtype = x.dtype

    # ---- per-generation VMEM budget (v5e/v6e: 128 MiB, v7x: 64 MiB) --------
    try:
        vmem_cap = int(getattr(pltpu.get_tpu_info(), "vmem_capacity_bytes",
                               64 * 1024 * 1024))
    except Exception:  # conservative fallback if the query is unavailable
        vmem_cap = 64 * 1024 * 1024
    vmem_limit = min((vmem_cap * 3) // 4, 100 * 1024 * 1024)

    # Grid-invariant weights/biases are still double-buffered by the default
    # pipeliner -> account 2x.
    w_itemsize = jnp.dtype(mxu_dtype).itemsize
    w_bytes = sum(
        int(w.size) * (w_itemsize if li < num_layers - 1 else 4)
        for li, (w, _) in enumerate(params))
    b_bytes = sum(out_dims) * 4
    resident = 2 * (w_bytes + b_bytes)

    # ---- batch tile sized from dims & budget (not a fixed 512 cap) ---------
    act_budget = max(vmem_limit - resident - (4 << 20), 1 << 20)
    per_row = (2 * Din * w_itemsize                 # double-buffered x tile
               + 2 * 4                              # double-buffered out row
               + 4 * (sum(out_dims) + max(out_dims) + Din))  # f32 temporaries
    tile_cap = min(int(act_budget // per_row), 8192)

    b_pad8 = _round_up(B, 8)
    if b_pad8 <= max(tile_cap, 128):
        tile_b = b_pad8                 # single full-extent batch block
        b_pad = b_pad8
    else:
        tile_b = max((tile_cap // 128) * 128, 128)  # lane-dense output blocks
        b_pad = _round_up(B, tile_b)    # pad instead of one giant block
    grid = (b_pad // tile_b,)

    # ---- host-side prep: pad batch, bf16 MXU feeds, pack biases ------------
    if b_pad != B:
        x = jnp.pad(x, ((0, b_pad - B), (0, 0)))
    x = x.astype(mxu_dtype)

    flat_inputs = [x]
    in_specs = [pl.BlockSpec((tile_b, Din), lambda i: (i, 0))]
    for li, (w, _) in enumerate(params):
        fan_in, _ = w.shape
        if li == num_layers - 1:
            w_in = w.reshape(1, fan_in).astype(jnp.float32)  # row vector, VPU
        else:
            w_in = w.astype(mxu_dtype)                       # MXU feed
        flat_inputs.append(w_in)
        # Same block every grid step -> stays VMEM-resident.
        in_specs.append(pl.BlockSpec(w_in.shape, lambda i: (0, 0)))
    b_all = jnp.concatenate(
        [b.reshape(1, -1).astype(jnp.float32) for _, b in params], axis=1)
    flat_inputs.append(b_all)
    in_specs.append(pl.BlockSpec(b_all.shape, lambda i: (0, 0)))

    kernel = functools.partial(_fused_mlp_kernel, out_dims=out_dims)

    out_row = pl.pallas_call(
        kernel,
        out_shape=jax.ShapeDtypeStruct((1, b_pad), out_dtype),
        grid=grid,
        in_specs=in_specs,
        # Lane-dense output: one (1, tile_b) row per grid step.
        out_specs=pl.BlockSpec((1, tile_b), lambda i: (0, i)),
        compiler_params=pltpu.CompilerParams(
            # NOTE: plain "parallel" is near-neutral; engaging v7x's second
            # TensorCore would need pltpu.CORE_PARALLEL gated on the chip
            # generation.  Kept portable/safe across v5e/v6e/v7x here.
            dimension_semantics=("parallel",),
            vmem_limit_bytes=int(vmem_limit),
        ),
    )(*flat_inputs)

    return out_row[0, :B].reshape(B, 1)


class Net2:
    """JAX/Pallas port of the PyTorch Net2 module.

    Linear layer sizes are [num_input] + layers + [1]; forward applies ReLU
    after every layer (including the last), exactly like the reference.
    """

    def __init__(self, num_input, layers, key, mxu_dtype=jnp.bfloat16):
        dims = [num_input] + list(layers) + [1]
        self.params = []
        for i in range(len(dims) - 1):
            fan_in, fan_out = dims[i], dims[i + 1]
            key, kw, kb = jax.random.split(key, 3)
            bound = fan_in ** -0.5
            # PyTorch nn.Linear default init: U(-1/sqrt(fan_in), 1/sqrt(fan_in)).
            w = jax.random.uniform(kw, (fan_in, fan_out), jnp.float32,
                                   minval=-bound, maxval=bound)
            b = jax.random.uniform(kb, (fan_out,), jnp.float32,
                                   minval=-bound, maxval=bound)
            self.params.append((w, b))
        print(len(self.params))
        # One XLA dispatch per forward: jit the fused kernel call.
        self._forward = jax.jit(
            functools.partial(mlp_forward, mxu_dtype=mxu_dtype))

    def __call__(self, x):
        return self._forward(self.params, x)


def _reference_forward_f32(params, x):
    """Pure-f32 JAX reference (module semantics)."""
    for w, b in params:
        x = jnp.maximum(x @ w + b, 0.0)
    return x


def _reference_forward_matched(params, x, mxu_dtype=jnp.bfloat16):
    """JAX reference with the same bf16-feed / f32-accumulate numerics."""
    num_layers = len(params)
    h = x.astype(mxu_dtype)
    for li, (w, b) in enumerate(params):
        if li < num_layers - 1:
            h = jnp.dot(h.astype(mxu_dtype), w.astype(mxu_dtype),
                        preferred_element_type=jnp.float32)
            h = jnp.maximum(h + b, 0.0)
        else:
            y = jnp.sum(h.astype(jnp.float32) * w.reshape(1, -1),
                        axis=-1, keepdims=True) + b
            h = jnp.maximum(y, 0.0)
    return h.astype(x.dtype)


if __name__ == "__main__":
    key = jax.random.PRNGKey(0)
    key, kx, kp = jax.random.split(key, 3)

    num_input = 32
    hidden_layers = [32, 16]
    batch = 8

    net = Net2(num_input, hidden_layers, kp)
    x = jax.random.normal(kx, (batch, num_input), jnp.float32)

    out = jax.block_until_ready(net(x))
    assert out.shape == (batch, 1), out.shape

    ref_matched = _reference_forward_matched(net.params, x)
    ref_f32 = _reference_forward_f32(net.params, x)
    assert jnp.allclose(out, ref_matched, atol=2e-3, rtol=2e-3), \
        "mismatch vs numerically-matched (bf16 MXU feed) JAX reference"
    assert jnp.allclose(out, ref_f32, atol=1e-1, rtol=1e-1), \
        "mismatch vs full-f32 JAX reference beyond bf16 rounding tolerance"

    print("KERNEL_OK")
</pallas_src>

<mosaic_0001>
module attributes {stable_mosaic.version = 11 : i64} {
  func.func @_fused_mlp_kernel(%arg0: i32, %arg1: memref<8x32xbf16, #tpu.memory_space<vmem>>, %arg2: memref<32x32xbf16, #tpu.memory_space<vmem>>, %arg3: memref<32x16xbf16, #tpu.memory_space<vmem>>, %arg4: memref<1x16xf32, #tpu.memory_space<vmem>>, %arg5: memref<1x49xf32, #tpu.memory_space<vmem>>, %arg6: memref<1x8xf32, #tpu.memory_space<vmem>>) attributes {dimension_semantics = [#tpu.dimension_semantics<parallel>], iteration_bounds = array<i64: 1>, scalar_prefetch = 0 : i64, scratch_operands = 0 : i64, tpu.core_type = #tpu.core_type<tc>, window_params = [{transform_indices = @transform_0, window_bounds = array<i64: 8, 32>}, {pipeline_mode = #tpu.pipeline_mode<synchronous>, transform_indices = @transform_1, window_bounds = array<i64: 32, 32>}, {pipeline_mode = #tpu.pipeline_mode<synchronous>, transform_indices = @transform_2, window_bounds = array<i64: 32, 16>}, {pipeline_mode = #tpu.pipeline_mode<synchronous>, transform_indices = @transform_3, window_bounds = array<i64: 1, 16>}, {pipeline_mode = #tpu.pipeline_mode<synchronous>, transform_indices = @transform_4, window_bounds = array<i64: 1, 49>}, {transform_indices = @transform_5, window_bounds = array<i64: 1, 8>}]} {
    %c0 = arith.constant 0 : index
    %c0_0 = arith.constant 0 : index
    %0 = vector.load %arg1[%c0, %c0_0] : memref<8x32xbf16, #tpu.memory_space<vmem>>, vector<8x32xbf16>
    %c0_1 = arith.constant 0 : index
    %c0_2 = arith.constant 0 : index
    %1 = vector.load %arg2[%c0_1, %c0_2] : memref<32x32xbf16, #tpu.memory_space<vmem>>, vector<32x32xbf16>
    %c0_3 = arith.constant 0 : index
    %c0_4 = arith.constant 0 : index
    %2 = vector.load %arg5[%c0_3, %c0_4] : memref<1x49xf32, #tpu.memory_space<vmem>>, vector<1x32xf32>
    %cst = arith.constant dense<0.000000e+00> : vector<8x32xf32>
    %3 = tpu.matmul %0, %1, %cst {dimension_numbers = #tpu.dot_dimension_numbers<[1], [0], [0], [1], [0, 0, 1, 1], [], []>} : vector<8x32xbf16>, vector<32x32xbf16>, vector<8x32xf32> -> vector<8x32xf32>
    %4 = vector.broadcast %2 : vector<1x32xf32> to vector<8x32xf32>
    %5 = arith.addf %3, %4 : vector<8x32xf32>
    %cst_5 = arith.constant 0.000000e+00 : f32
    %6 = vector.broadcast %cst_5 : f32 to vector<8x32xf32>
    %7 = arith.maximumf %5, %6 : vector<8x32xf32>
    %c0_6 = arith.constant 0 : index
    %c0_7 = arith.constant 0 : index
    %8 = vector.load %arg3[%c0_6, %c0_7] : memref<32x16xbf16, #tpu.memory_space<vmem>>, vector<32x16xbf16>
    %c0_8 = arith.constant 0 : index
    %c32 = arith.constant 32 : index
    %9 = vector.load %arg5[%c0_8, %c32] : memref<1x49xf32, #tpu.memory_space<vmem>>, vector<1x16xf32>
    %10 = arith.truncf %7 : vector<8x32xf32> to vector<8x32xbf16>
    %cst_9 = arith.constant dense<0.000000e+00> : vector<8x16xf32>
    %11 = tpu.matmul %10, %8, %cst_9 {dimension_numbers = #tpu.dot_dimension_numbers<[1], [0], [0], [1], [0, 0, 1, 1], [], []>} : vector<8x32xbf16>, vector<32x16xbf16>, vector<8x16xf32> -> vector<8x16xf32>
    %12 = vector.broadcast %9 : vector<1x16xf32> to vector<8x16xf32>
    %13 = arith.addf %11, %12 : vector<8x16xf32>
    %cst_10 = arith.constant 0.000000e+00 : f32
    %14 = vector.broadcast %cst_10 : f32 to vector<8x16xf32>
    %15 = arith.maximumf %13, %14 : vector<8x16xf32>
    %c0_11 = arith.constant 0 : index
    %c0_12 = arith.constant 0 : index
    %16 = vector.load %arg4[%c0_11, %c0_12] : memref<1x16xf32, #tpu.memory_space<vmem>>, vector<1x16xf32>
    %c0_13 = arith.constant 0 : index
    %c48 = arith.constant 48 : index
    %17 = vector.load %arg5[%c0_13, %c48] : memref<1x49xf32, #tpu.memory_space<vmem>>, vector<1x1xf32>
    %18 = vector.broadcast %16 : vector<1x16xf32> to vector<8x16xf32>
    %19 = arith.mulf %15, %18 : vector<8x16xf32>
    %cst_14 = arith.constant dense<0.000000e+00> : vector<8xf32>
    %20 = vector.multi_reduction <add>, %19, %cst_14 [1] : vector<8x16xf32> to vector<8xf32>
    %21 = vector.shape_cast %20 : vector<8xf32> to vector<8x1xf32>
    %22 = vector.broadcast %17 : vector<1x1xf32> to vector<8x1xf32>
    %23 = arith.addf %21, %22 : vector<8x1xf32>
    %cst_15 = arith.constant 0.000000e+00 : f32
    %24 = vector.broadcast %cst_15 : f32 to vector<8x1xf32>
    %25 = arith.maximumf %23, %24 : vector<8x1xf32>
    %26 = tpu.transpose %25, [1, 0] : vector<8x1xf32> -> vector<1x8xf32>
    %c0_16 = arith.constant 0 : index
    %c0_17 = arith.constant 0 : index
    %27 = vector.load %arg6[%c0_16, %c0_17] : memref<1x8xf32, #tpu.memory_space<vmem>>, vector<1x8xf32>
    tpu.vector_store %arg6[%c0_16, %c0_17], %26 {strides = array<i32>} : memref<1x8xf32, #tpu.memory_space<vmem>>, vector<1x8xf32>,
    return
  }
  func.func @transform_0(%arg0: i32) -> (i32, i32) {
    %c0_i32 = arith.constant 0 : i32
    %c0_i32_0 = arith.constant 0 : i32
    return %arg0, %c0_i32 : i32, i32
  }
  func.func @transform_1(%arg0: i32) -> (i32, i32) {
    %c0_i32 = arith.constant 0 : i32
    %c0_i32_0 = arith.constant 0 : i32
    %c0_i32_1 = arith.constant 0 : i32
    return %c0_i32, %c0_i32_0 : i32, i32
  }
  func.func @transform_2(%arg0: i32) -> (i32, i32) {
    %c0_i32 = arith.constant 0 : i32
    %c0_i32_0 = arith.constant 0 : i32
    %c0_i32_1 = arith.constant 0 : i32
    return %c0_i32, %c0_i32_0 : i32, i32
  }
  func.func @transform_3(%arg0: i32) -> (i32, i32) {
    %c0_i32 = arith.constant 0 : i32
    %c0_i32_0 = arith.constant 0 : i32
    %c0_i32_1 = arith.constant 0 : i32
    return %c0_i32, %c0_i32_0 : i32, i32
  }
  func.func @transform_4(%arg0: i32) -> (i32, i32) {
    %c0_i32 = arith.constant 0 : i32
    %c0_i32_0 = arith.constant 0 : i32
    %c0_i32_1 = arith.constant 0 : i32
    return %c0_i32, %c0_i32_0 : i32, i32
  }
  func.func @transform_5(%arg0: i32) -> (i32, i32) {
    %c0_i32 = arith.constant 0 : i32
    %c0_i32_0 = arith.constant 0 : i32
    return %c0_i32, %arg0 : i32, i32
  }
}

</mosaic_0001>

<bundles_post_ra>
// kernel: mlp_forward.1
= control target key start
LH: loop header
LB: loop body
LE: loop exit
PB: predicated region body
PF: predicated region fallthrough
CT: control target
= control target key end

     0   :  { %s274_s0 = inlined_call_operand.vmem [shape: bf16[8,32], index: 0, kind: input, shape index: {}]   ;;  %s275_s1 = inlined_call_operand.vmem [shape: bf16[32,32], index: 1, kind: input, shape index: {}]   ;;  %s276_s2 = inlined_call_operand.vmem [shape: bf16[32,16], index: 2, kind: input, shape index: {}]   ;;  %s277_s3 = inlined_call_operand.vmem [shape: f32[1,16], index: 3, kind: input, shape index: {}]   ;;  %s278_s4 = inlined_call_operand.vmem [shape: f32[1,49], index: 4, kind: input, shape index: {}]   ;;  %s279_s5 = inlined_call_operand.hbm [shape: f32[1,8], index: 5, kind: output, shape index: {}]  }
   0x1   :  { %v182_v0 = vld [vmem:[%s275_s1 + $0x8] sm:$0xff]  ;;  %v181_v1 = vld [vmem:[%s275_s1] sm:$0xff] }
   0x2   :  { %53 = vmatpush.bf16.msra.mxu0 %v182_v0 }
   0x3   :  { %10 = vsyncpa [#allocation3], 0  ;;  %v22_v2 = vld [vmem:[%s274_s0] sm:$0xf]  ;;  %vm43_vm0 = vcmask 261120   ;;  %s217_s26 = smov 96  }
   0x4   :  { %v189_v3 = vld [vmem:[%s278_s4] ss:$0 sm:$0xff]  ;;  %v184_v4 = vld [vmem:[%s276_s2 + $0x8] sm:$0xff]  ;;  %vm103_vm1 = vcmask 130048   ;;  %s219_s30 = smov [#allocation2]   ;;  %s154_s9 = sshll.u32 %s279_s5, 4  ;;  %s155_s9 = int_to_ptr.hbm [resolvable:$true] %s154_s9 }
   0x5   :  { %78 = vrot.lane.b32.xlu0 %v189_v3, %s217_s26  ;;  %90 = vmatpush.bf16.msra.mxu1 %v184_v4  ;;  %v183_v5 = vld [vmem:[%s276_s2] sm:$0xff]  ;;  %s218_s2 = smov 80   ;;  %s152_s6 = sshll.u32 %s219_s30, 4  ;;  %vm145_vm2 = vcmask 57344   ;;  %s153_s6 = int_to_ptr.vmem [resolvable:$true] %s152_s6 }
   0x6   :  { %54 = vmatpush.bf16.msra.mxu0 %v181_v1  ;;  %v190_v14 = vld [vmem:[%s277_s3] ss:$0 sm:$0xff] }
   0x9   :  { %171 = vmatmul.msk.bf16.vlgmr.msra.gmra.mxu0 %vm43_vm0, %v22_v2  ;;  %91 = vmatpush.bf16.msra.mxu1 %v183_v5 }
  0x77   :  { %v79_v11 = vpop.permute.xlu0 %78 }
  0x86   :  { %v56_v6 = vpop.f32.mrf.mxu0 }
  0x87   :  { %v57_v7 = vadd.f32 %v189_v3, %v56_v6 }
  0x89   :  { %v60_v8 = vmax.f32 %v57_v7, 0.0 }
  0x8b   :  { %v65_v9 = vpack.c.bf16 %v60_v8, %v60_v8 }
  0x8d   :  { %180 = vmatmul.msk.bf16.vlgmr.msra.gmra.mxu1 %vm43_vm0, %v65_v9 }
  0x8e   :  { %v58_v10 = vpop.f32.mrf.mxu0 }
 0x10a   :  { %v93_v12 = vpop.f32.mrf.mxu1 }
 0x10b   :  { %v94_v13 = vadd.f32 %v93_v12, %v79_v11 }
 0x10d   :  { %v97_v15 = vmax.f32 %v94_v13, 0.0 }
 0x10f   :  { %v102_v16 = vmul.f32 %v190_v14, %v97_v15 }
 0x111   :  { %v104_v17 = vsel %vm103_vm1, %v102_v16, 0.0 }
 0x112   :  { %v95_v18 = vpop.f32.mrf.mxu1  ;;  %105 = vadd.xlane.f32.xlu0 %v104_v17 }
 0x185   :  { %v106_v19 = vpop.xlane.xlu0 %105 }
 0x186   :  { %v107_v20 = vadd.f32 %v189_v3, %v106_v19 }
 0x188   :  { %v108_v21 = vmax.f32 %v107_v20, 0.0 }
 0x18a   :  { %110 = vrot.lane.b32.xlu1 %v108_v21, %s218_s2 }
 0x1fc   :  { %v111_v22 = vpop.permute.xlu1 %110 }
 0x1fd   :  { %113 = vxpose.xlu1.b32.start.end [1/1] (short) (narrow) %v111_v22, 8 }
 0x2a1   :  { %v129_v23 = vpop.trf.xlu1 }
 0x2a2   :  { %146 = vst.msk [vmem:[#allocation2] sm:$0x1] %vm145_vm2, %v129_v23 }
 0x2a3   :  { %157 = dma.vmem_to_hbm [thread:$0]  %s153_s6, 16, %s155_s9, [#allocation3]  }
 0x2a4   :  { %215 = dma.done.wait [#allocation3], 16  }
 0x2a5   :  { %216 = vsyncadd [#allocation3], 4294967280 }
 0x2a6   :  { %162 = vsyncpa [#allocation3], 1 }

</bundles_post_ra>
